<compile_context>
chip_gen: v7x
topology: tpu7x:2x2x1
jax: 0.10.0
libtpu: 0.0.40
codegen_flags: <defaults>
</compile_context>

<pallas_src>
import functools

import jax
import jax.numpy as jnp
from jax.experimental import pallas as pl
from jax.experimental.pallas import tpu as pltpu


def _dropout_kernel(bits_ref, x_ref, o_ref, *, threshold: int, inv_keep: float):
    # bits_ref: (N_SLAB, 1, HW) uint32 random bits -> one mask row per (b, c) slab
    # x_ref / o_ref: (N_SLAB, T, HW) activation tiles
    keep = bits_ref[...] < jnp.uint32(threshold)            # P(keep) = 1 - p
    mask = jnp.where(
        keep,
        jnp.asarray(inv_keep, dtype=x_ref.dtype),
        jnp.asarray(0, dtype=x_ref.dtype),
    )                                                        # (N_SLAB, 1, HW)
    o_ref[...] = x_ref[...] * mask                           # broadcast over T


def _choose_n_slab(bc: int, slab_bytes: int, cap_bytes: int = 6 << 20) -> int:
    """Largest divisor of bc whose x-block (n_slab * slab_bytes) fits the cap."""
    best = 1
    for d in range(1, bc + 1):
        if bc % d == 0 and d * slab_bytes <= cap_bytes:
            best = d
    return best


def custom_dropout(x: jax.Array, p: float, key: jax.Array) -> jax.Array:
    """x: (B, C, T, H, W). Returns x * mask, mask shared over T, scaled by 1/(1-p)."""
    if p <= 0.0:
        return x
    if p >= 1.0:
        return jnp.zeros_like(x)

    keep_prob = 1.0 - p
    inv_keep = 1.0 / keep_prob
    # Integer Bernoulli threshold on uniform uint32 bits.
    threshold = min(int(round(keep_prob * float(1 << 32))), (1 << 32) - 1)

    B, C, T, H, W = x.shape
    BC, HW = B * C, H * W
    x3 = x.reshape(BC, T, HW)

    # One mask row per (b, c) slab, shared across the time axis.
    bits = jax.random.bits(key, (BC, 1, HW), jnp.uint32)

    slab_bytes = T * HW * x.dtype.itemsize
    n_slab = _choose_n_slab(BC, slab_bytes)       # block <= ~6 MiB per buffer
    grid = (BC // n_slab,)

    kernel = functools.partial(
        _dropout_kernel, threshold=threshold, inv_keep=inv_keep
    )

    out = pl.pallas_call(
        kernel,
        out_shape=jax.ShapeDtypeStruct((BC, T, HW), x.dtype),
        grid=grid,
        in_specs=[
            pl.BlockSpec((n_slab, 1, HW), lambda i: (i, 0, 0)),   # mask bits
            pl.BlockSpec((n_slab, T, HW), lambda i: (i, 0, 0)),   # activations
        ],
        out_specs=pl.BlockSpec((n_slab, T, HW), lambda i: (i, 0, 0)),
        compiler_params=pltpu.CompilerParams(
            dimension_semantics=("parallel",),     # slab axis shards across TCs (v7x)
            vmem_limit_bytes=48 << 20,             # 2x(in+out) buffers <= ~24 MiB
        ),
    )(bits, x3)

    return out.reshape(B, C, T, H, W)


if __name__ == "__main__":
    root = jax.random.PRNGKey(0)
    x_key, mask_key = jax.random.split(root)

    B, C, T, H, W = 2, 4, 8, 16, 16
    x = jax.random.normal(x_key, (B, C, T, H, W), dtype=jnp.float32)
    p = 0.3

    y = custom_dropout(x, p, mask_key)
    y = jax.block_until_ready(y)

    # Sanity checks of the dropout semantics (mask shared over time, scaled).
    scale = 1.0 / (1.0 - p)
    safe = jnp.abs(x) > 1e-6
    ratio = jnp.where(safe, y / jnp.where(safe, x, 1.0), 0.0)

    # Every (safe) element is either 0 or 1/(1-p).
    ok_vals = bool(
        jnp.all(
            (~safe)
            | (jnp.abs(ratio) < 1e-5)
            | (jnp.abs(ratio - scale) < 1e-4)
        )
    )
    # Mask identical across the time axis.
    ref_ratio = jnp.max(ratio, axis=2, keepdims=True)
    ok_time = bool(jnp.all((~safe) | (jnp.abs(ratio - ref_ratio) < 1e-4)))

    assert ok_vals, "mask values not in {0, 1/(1-p)}"
    assert ok_time, "mask not shared across time axis"
    assert y.shape == x.shape and y.dtype == x.dtype

    # p >= 1.0 edge case returns zeros.
    assert bool(jnp.all(custom_dropout(x, 1.0, mask_key) == 0.0))

    print("KERNEL_OK")
</pallas_src>

<mosaic_0001>
module attributes {stable_mosaic.version = 11 : i64} {
  func.func @_dropout_kernel(%arg0: i32, %arg1: memref<8x1x256xi32, #tpu.memory_space<vmem>>, %arg2: memref<8x8x256xf32, #tpu.memory_space<vmem>>, %arg3: memref<8x8x256xf32, #tpu.memory_space<vmem>>) attributes {dimension_semantics = [#tpu.dimension_semantics<parallel>], iteration_bounds = array<i64: 1>, scalar_prefetch = 0 : i64, scratch_operands = 0 : i64, tpu.core_type = #tpu.core_type<tc>, window_params = [{transform_indices = @transform_0, window_bounds = array<i64: 8, 1, 256>}, {transform_indices = @transform_1, window_bounds = array<i64: 8, 8, 256>}, {transform_indices = @transform_2, window_bounds = array<i64: 8, 8, 256>}]} {
    %c0 = arith.constant 0 : index
    %c0_0 = arith.constant 0 : index
    %c0_1 = arith.constant 0 : index
    %0 = vector.load %arg1[%c0, %c0_0, %c0_1] : memref<8x1x256xi32, #tpu.memory_space<vmem>>, vector<8x1x256xi32>
    %c-1288490189_i32 = arith.constant -1288490189 : i32
    %1 = vector.broadcast %c-1288490189_i32 : i32 to vector<8x1x256xi32>
    %2 = arith.cmpi ult, %0, %1 : vector<8x1x256xi32>
    %cst = arith.constant 1.42857146 : f32
    %cst_2 = arith.constant 0.000000e+00 : f32
    %3 = vector.broadcast %cst : f32 to vector<8x1x256xf32>
    %4 = vector.broadcast %cst_2 : f32 to vector<8x1x256xf32>
    %5 = arith.select %2, %3, %4 : vector<8x1x256xi1>, vector<8x1x256xf32>
    %c0_3 = arith.constant 0 : index
    %c0_4 = arith.constant 0 : index
    %c0_5 = arith.constant 0 : index
    %6 = vector.load %arg2[%c0_3, %c0_4, %c0_5] : memref<8x8x256xf32, #tpu.memory_space<vmem>>, vector<8x8x256xf32>
    %7 = vector.broadcast %5 : vector<8x1x256xf32> to vector<8x8x256xf32>
    %8 = arith.mulf %6, %7 : vector<8x8x256xf32>
    %c0_6 = arith.constant 0 : index
    %c0_7 = arith.constant 0 : index
    %c0_8 = arith.constant 0 : index
    %9 = vector.load %arg3[%c0_6, %c0_7, %c0_8] : memref<8x8x256xf32, #tpu.memory_space<vmem>>, vector<8x8x256xf32>
    tpu.vector_store %arg3[%c0_6, %c0_7, %c0_8], %8 {strides = array<i32>} : memref<8x8x256xf32, #tpu.memory_space<vmem>>, vector<8x8x256xf32>,
    return
  }
  func.func @transform_0(%arg0: i32) -> (i32, i32, i32) {
    %c0_i32 = arith.constant 0 : i32
    %c0_i32_0 = arith.constant 0 : i32
    %c0_i32_1 = arith.constant 0 : i32
    return %arg0, %c0_i32, %c0_i32_0 : i32, i32, i32
  }
  func.func @transform_1(%arg0: i32) -> (i32, i32, i32) {
    %c0_i32 = arith.constant 0 : i32
    %c0_i32_0 = arith.constant 0 : i32
    %c0_i32_1 = arith.constant 0 : i32
    return %arg0, %c0_i32, %c0_i32_0 : i32, i32, i32
  }
  func.func @transform_2(%arg0: i32) -> (i32, i32, i32) {
    %c0_i32 = arith.constant 0 : i32
    %c0_i32_0 = arith.constant 0 : i32
    %c0_i32_1 = arith.constant 0 : i32
    return %arg0, %c0_i32, %c0_i32_0 : i32, i32, i32
  }
}

</mosaic_0001>

<bundles_post_ra>
// kernel: tpu_custom_call.1
= control target key start
LH: loop header
LB: loop body
LE: loop exit
PB: predicated region body
PF: predicated region fallthrough
CT: control target
= control target key end

     0   :  { %7 = vsyncpa [#allocation3], 0  ;;  %s391_s0 = inlined_call_operand.hbm [shape: u32[8,1,256], index: 0, kind: input, shape index: {}]   ;;  %s392_s1 = inlined_call_operand.hbm [shape: f32[8,8,256], index: 1, kind: input, shape index: {}]   ;;  %s393_s2 = inlined_call_operand.hbm [shape: f32[8,8,256], index: 2, kind: output, shape index: {}]  }
   0x1   :  { %8 = vsyncpa [#allocation6], 0 }
   0x2   :  { %9 = vsyncpa [#allocation4], 0  ;;  %s298_s9 = smov [#allocation2]   ;;  %s226_s13 = scalar_lea.hbm %s391_s0, 256 }
   0x3   :  { %s15_s10 = sshll.u32 %s298_s9, 4  ;;  %p227_p0 = scmp.ne.s32.totalorder %s391_s0, %s226_s13  ;;  %s16_s10 = int_to_ptr.vmem [resolvable:$true] %s15_s10 }
   0x4   :  { %p230_p1 = scmp.lt.u32.totalorder %s226_s13, %s391_s0 }
   0x6   :  { %p232_p2 = pnand %p230_p1, %p227_p0 }
   0x8   :  { %235 = shalt.err (!%p232_p2)
}
   0x9   :  { %s236_s18 = scalar_lea.vmem %s16_s10, 256  ;;  %p241_p4 = scmp.lt.s32.totalorder %s16_s10, %s16_s10 }
   0xa   :  { %p237_p3 = scmp.ne.s32.totalorder %s16_s10, %s236_s18  ;;  %p242_p5 = scmp.lt.s32.totalorder %s236_s18, %s236_s18 }
   0xc   :  { %p243_p6 = por %p242_p5, %p241_p4 }
   0xe   :  { %p244_p7 = pnand %p243_p6, %p237_p3 }
  0x10   :  { %247 = shalt.err (!%p244_p7)
}
  0x11   :  { %s299_s19 = smov 32   ;;  %s300_s20 = smov 2  }
  0x12   :  { %21 = dma.hbm_to_vmem [thread:$0]  %s391_s0, 256, %s16_s10, [#allocation3], %s299_s19, %s299_s19, %s300_s20  }
  0x13   :  { %s301_s23 = smov [#allocation5]   ;;  %s248_s27 = scalar_lea.hbm %s392_s1, 2048 }
  0x14   :  { %s27_s24 = sshll.u32 %s301_s23, 4  ;;  %p249_p8 = scmp.ne.s32.totalorder %s392_s1, %s248_s27  ;;  %s28_s24 = int_to_ptr.vmem [resolvable:$true] %s27_s24 }
  0x15   :  { %p252_p9 = scmp.lt.u32.totalorder %s248_s27, %s392_s1 }
  0x17   :  { %p254_p10 = pnand %p252_p9, %p249_p8 }
  0x19   :  { %257 = shalt.err (!%p254_p10)
}
  0x1a   :  { %s258_s4 = scalar_lea.vmem %s28_s24, 2048  ;;  %p263_p12 = scmp.lt.s32.totalorder %s28_s24, %s28_s24 }
  0x1b   :  { %p259_p11 = scmp.ne.s32.totalorder %s28_s24, %s258_s4  ;;  %p264_p13 = scmp.lt.s32.totalorder %s258_s4, %s258_s4 }
  0x1d   :  { %p265_p0 = por %p264_p13, %p263_p12 }
  0x1f   :  { %p266_p1 = pnand %p265_p0, %p259_p11 }
  0x21   :  { %269 = shalt.err (!%p266_p1)
}
  0x22   :  { %s302_s0 = smov 256   ;;  %s303_s5 = smov 16  }
  0x23   :  { %33 = dma.hbm_to_vmem [thread:$0]  %s392_s1, 2048, %s28_s24, [#allocation6], %s302_s0, %s302_s0, %s303_s5  }
  0x24   :  { %292 = dma.done.wait [#allocation3], 256  }
  0x25   :  { %293 = vsyncadd [#allocation3], 4294967040 }
  0x26   :  { %294 = dma.done.wait [#allocation6], 2048  }
  0x27   :  { %295 = vsyncadd [#allocation6], 4294965248  ;;  %v88_v0 = vlaneseq  ;;  %v40_v4 = vld [vmem:[#allocation2] sm:$0x3]  ;;  %v64_v5 = vld [vmem:[#allocation5] sm:$0xff]  ;;  %v304_v8 = vmov 0.0  }
  0x28   :  { %vm48_vm0 = vcmp.lt.u32.totalorder %v40_v4, 3006477107  ;;  %v65_v6 = vld [vmem:[#allocation5 + $0x8] sm:$0xff]  ;;  %v41_v7 = vld [vmem:[#allocation2 + $0x2] sm:$0x3]  ;;  %v67_v15 = vld [vmem:[#allocation5 + $0x18] sm:$0xff] }
  0x29   :  { %v89_v1 = vshrl.u32 %v88_v0, 7  ;;  %v56_v9 = vsel %vm48_vm0, 1.4285715, %v304_v8  ;;  %vm49_vm1 = vcmp.lt.u32.totalorder %v41_v7, 3006477107  ;;  %v66_v14 = vld [vmem:[#allocation5 + $0x10] sm:$0xff] }
  0x2a   :  { %v42_v10 = vld [vmem:[#allocation2 + $0x4] sm:$0x3]  ;;  %v57_v13 = vsel %vm49_vm1, 1.4285715, %v304_v8  ;;  %v68_v19 = vld [vmem:[#allocation5 + $0x20] sm:$0xff]  ;;  %v69_v20 = vld [vmem:[#allocation5 + $0x28] sm:$0xff] }
  0x2b   :  { %v348_v2 = vsub.s32 0, %v89_v1  ;;  %v350_v3 = vsub.s32 1, %v89_v1  ;;  %vm50_vm2 = vcmp.lt.u32.totalorder %v42_v10, 3006477107  ;;  %v43_v21 = vld [vmem:[#allocation2 + $0x6] sm:$0x3] }
  0x2c   :  { %v58_v18 = vsel %vm50_vm2, 1.4285715, %v304_v8  ;;  %v70_v26 = vld [vmem:[#allocation5 + $0x30] sm:$0xff]  ;;  %v71_v27 = vld [vmem:[#allocation5 + $0x38] sm:$0xff]  ;;  %vm51_vm3 = vcmp.lt.u32.totalorder %v43_v21, 3006477107 }
  0x2d   :  { %v91_v11 = vrot.slane %v56_v9, %v348_v2  ;;  %v95_v12 = vrot.slane %v56_v9, %v350_v3  ;;  %v99_v16 = vrot.slane %v57_v13, %v348_v2  ;;  %v103_v17 = vrot.slane %v57_v13, %v350_v3  ;;  %v44_v28 = vld [vmem:[#allocation2 + $0x8] sm:$0x3]  ;;  %v45_v31 = vld [vmem:[#allocation2 + $0xa] sm:$0x3]  ;;  %v72_v36 = vld [vmem:[#allocation5 + $0x40] sm:$0xff]  ;;  %s305_s1 = smov [#allocation7]  }
  0x2e   :  { %v107_v24 = vrot.slane %v58_v18, %v348_v2  ;;  %v111_v25 = vrot.slane %v58_v18, %v350_v3  ;;  %vm52_vm4 = vcmp.lt.u32.totalorder %v44_v28, 3006477107  ;;  %v59_v34 = vsel %vm51_vm3, 1.4285715, %v304_v8  ;;  %v73_v37 = vld [vmem:[#allocation5 + $0x48] sm:$0xff]  ;;  %v74_v43 = vld [vmem:[#allocation5 + $0x50] sm:$0xff] }
  0x2f   :  { %v168_v22 = vmul.f32 %v91_v11, %v64_v5  ;;  %v169_v23 = vmul.f32 %v95_v12, %v65_v6  ;;  %v170_v29 = vmul.f32 %v99_v16, %v66_v14  ;;  %v171_v30 = vmul.f32 %v103_v17, %v67_v15  ;;  %v46_v42 = vld [vmem:[#allocation2 + $0xc] sm:$0x3]  ;;  %v47_v44 = vld [vmem:[#allocation2 + $0xe] sm:$0x3]  ;;  %v76_v50 = vld [vmem:[#allocation5 + $0x60] sm:$0xff]  ;;  %s205_s8 = sshll.u32 %s305_s1, 4  ;;  %s206_s8 = int_to_ptr.vmem [resolvable:$true] %s205_s8 }
  0x30   :  { %v172_v32 = vmul.f32 %v107_v24, %v68_v19  ;;  %v173_v33 = vmul.f32 %v111_v25, %v69_v20  ;;  %v60_v35 = vsel %vm52_vm4, 1.4285715, %v304_v8  ;;  %v115_v38 = vrot.slane %v59_v34, %v348_v2  ;;  %v75_v49 = vld [vmem:[#allocation5 + $0x58] sm:$0xff]  ;;  %v77_v51 = vld [vmem:[#allocation5 + $0x68] sm:$0xff]  ;;  %v78_v63 = vld [vmem:[#allocation5 + $0x70] sm:$0xff]  ;;  %s270_s9 = scalar_lea.vmem %s206_s8, 2048  ;;  %p275_p3 = scmp.lt.s32.totalorder %s206_s8, %s206_s8 }
  0x31   :  { %184 = vst [vmem:[#allocation7] sm:$0xff] %v168_v22  ;;  %185 = vst [vmem:[#allocation7 + $0x8] sm:$0xff] %v169_v23  ;;  %v119_v39 = vrot.slane %v59_v34, %v350_v3  ;;  %v123_v40 = vrot.slane %v60_v35, %v348_v2  ;;  %v127_v41 = vrot.slane %v60_v35, %v350_v3  ;;  %vm53_vm5 = vcmp.lt.u32.totalorder %v45_v31, 3006477107  ;;  %v79_v0 = vld [vmem:[#allocation5 + $0x78] sm:$0xff]  ;;  %p271_p2 = scmp.ne.s32.totalorder %s206_s8, %s270_s9  ;;  %p276_p4 = scmp.lt.s32.totalorder %s270_s9, %s270_s9 }
  0x32   :  { %186 = vst [vmem:[#allocation7 + $0x10] sm:$0xff] %v170_v29  ;;  %187 = vst [vmem:[#allocation7 + $0x18] sm:$0xff] %v171_v30  ;;  %vm54_vm6 = vcmp.lt.u32.totalorder %v46_v42, 3006477107  ;;  %v174_v45 = vmul.f32 %v115_v38, %v70_v26  ;;  %v61_v52 = vsel %vm53_vm5, 1.4285715, %v304_v8 }
  0x33   :  { %188 = vst [vmem:[#allocation7 + $0x20] sm:$0xff] %v172_v32  ;;  %189 = vst [vmem:[#allocation7 + $0x28] sm:$0xff] %v173_v33  ;;  %v175_v46 = vmul.f32 %v119_v39, %v71_v27  ;;  %v176_v47 = vmul.f32 %v123_v40, %v72_v36  ;;  %v177_v48 = vmul.f32 %v127_v41, %v73_v37  ;;  %v62_v53 = vsel %vm54_vm6, 1.4285715, %v304_v8  ;;  %p277_p5 = por %p276_p4, %p275_p3 }
  0x34   :  { %vm55_vm7 = vcmp.lt.u32.totalorder %v47_v44, 3006477107  ;;  %190 = vst [vmem:[#allocation7 + $0x30] sm:$0xff] %v174_v45  ;;  %v131_v54 = vrot.slane %v61_v52, %v348_v2  ;;  %v135_v55 = vrot.slane %v61_v52, %v350_v3  ;;  %v139_v56 = vrot.slane %v62_v53, %v348_v2 }
  0x35   :  { %191 = vst [vmem:[#allocation7 + $0x38] sm:$0xff] %v175_v46  ;;  %192 = vst [vmem:[#allocation7 + $0x40] sm:$0xff] %v176_v47  ;;  %v143_v57 = vrot.slane %v62_v53, %v350_v3  ;;  %v63_v58 = vsel %vm55_vm7, 1.4285715, %v304_v8  ;;  %p278_p6 = pnand %p277_p5, %p271_p2 }
  0x36   :  { %193 = vst [vmem:[#allocation7 + $0x48] sm:$0xff] %v177_v48  ;;  %v178_v59 = vmul.f32 %v131_v54, %v74_v43  ;;  %v179_v60 = vmul.f32 %v135_v55, %v75_v49  ;;  %v180_v61 = vmul.f32 %v139_v56, %v76_v50  ;;  %v147_v1 = vrot.slane %v63_v58, %v348_v2 }
  0x37   :  { %v181_v62 = vmul.f32 %v143_v57, %v77_v51  ;;  %v151_v4 = vrot.slane %v63_v58, %v350_v3 }
  0x38   :  { %194 = vst [vmem:[#allocation7 + $0x50] sm:$0xff] %v178_v59  ;;  %195 = vst [vmem:[#allocation7 + $0x58] sm:$0xff] %v179_v60  ;;  %v182_v5 = vmul.f32 %v147_v1, %v78_v63 }
  0x39   :  { %196 = vst [vmem:[#allocation7 + $0x60] sm:$0xff] %v180_v61  ;;  %197 = vst [vmem:[#allocation7 + $0x68] sm:$0xff] %v181_v62  ;;  %v183_v6 = vmul.f32 %v151_v4, %v79_v0 }
  0x3a   :  { %198 = vst [vmem:[#allocation7 + $0x70] sm:$0xff] %v182_v5 }
  0x3b   :  { %199 = vst [vmem:[#allocation7 + $0x78] sm:$0xff] %v183_v6 }
  0x3c   :  { %281 = shalt.err (!%p278_p6)
}
  0x3d   :  { %s282_s12 = scalar_lea.hbm %s393_s2, 2048 }
  0x3e   :  { %p283_p7 = scmp.ne.s32.totalorder %s393_s2, %s282_s12  ;;  %p286_p8 = scmp.lt.u32.totalorder %s282_s12, %s393_s2 }
  0x40   :  { %p288_p9 = pnand %p286_p8, %p283_p7 }
  0x42   :  { %291 = shalt.err (!%p288_p9)
}
  0x43   :  { %211 = dma.vmem_to_hbm [thread:$0]  %s206_s8, 2048, %s393_s2, [#allocation4], %s302_s0, %s302_s0, %s303_s5  }
  0x44   :  { %296 = dma.done.wait [#allocation4], 2048  }
  0x45   :  { %297 = vsyncadd [#allocation4], 4294965248 }
  0x46   :  { %215 = vsyncpa [#allocation3], 1 }
  0x47   :  { %216 = vsyncpa [#allocation6], 1 }
  0x48   :  { %217 = vsyncpa [#allocation4], 1 }

</bundles_post_ra>
